<compile_context>
chip_gen: v7x
topology: tpu7x:2x2x1
jax: 0.10.0
libtpu: 0.0.40
codegen_flags: <defaults>
</compile_context>

<pallas_src>
import jax
import jax.numpy as jnp
from jax.experimental import pallas as pl
from jax.experimental.pallas import tpu as pltpu


def _round_up(n, m):
    return ((n + m - 1) // m) * m


def dce_loss_kernel(x_ref, c_ref, cs_ref, out_ref):
    # x_ref: (TM, D), c_ref: (D, TN), cs_ref: (1, TN), out_ref: (TM, TN)
    x = x_ref[...]
    # ||x||^2 per row -> (TM, 1); cheap VPU/XLU work hidden under the matmul.
    features_square = jnp.sum(x * x, axis=1, keepdims=True)
    # 2 * x @ centers on the MXU with f32 accumulation.
    features_into_centers = 2.0 * jnp.dot(
        x, c_ref[...], preferred_element_type=jnp.float32
    )
    # -dist = -(||x||^2 + ||c||^2 - 2 x.c) = 2 x.c - ||x||^2 - ||c||^2
    out_ref[...] = (
        features_into_centers - features_square - cs_ref[...]
    ).astype(out_ref.dtype)


def _pick_tiles(B, C, D, *, tm_max=512, tn_max=512, vmem_budget=24 << 20):
    """Choose (TM, TN) multiples of (8, 128) that fit the VMEM budget."""
    TM = min(tm_max, _round_up(B, 8))
    TN = min(tn_max, _round_up(C, 128))

    def working_set(tm, tn):
        # double-buffered inputs + output, f32
        return 2 * 4 * (tm * D + D * tn + tn + tm * tn)

    # Shrink TM first (keeps the output lane-dense), then TN, until it fits.
    while TM > 8 and working_set(TM, TN) > vmem_budget:
        TM = max(8, _round_up(TM // 2, 8))
    while TN > 128 and working_set(TM, TN) > vmem_budget:
        TN = max(128, _round_up(TN // 2, 128))
    return TM, TN


def dce_loss_forward(x, centers):
    """Returns (centers, -dist) exactly like the PyTorch module's forward."""
    x = x.astype(jnp.float32)
    centers = centers.astype(jnp.float32)

    B, D = x.shape
    D2, C = centers.shape
    assert D == D2, f"feat_dim mismatch: {D} vs {D2}"

    TM, TN = _pick_tiles(B, C, D)
    Bp = _round_up(B, TM)
    Cp = _round_up(C, TN)

    # Pad ragged edges with zeros (padded rows/cols are sliced off below).
    x_p = x if Bp == B else jnp.pad(x, ((0, Bp - B), (0, 0)))
    c_p = centers if Cp == C else jnp.pad(centers, ((0, 0), (0, Cp - C)))

    # Hoisted once (wrapper-side XLA): ||center||^2 per class column, (1, Cp).
    centers_square = jnp.sum(c_p * c_p, axis=0, keepdims=True)

    grid = (Bp // TM, Cp // TN)

    neg_dist_p = pl.pallas_call(
        dce_loss_kernel,
        out_shape=jax.ShapeDtypeStruct((Bp, Cp), jnp.float32),
        grid_spec=pl.GridSpec(
            grid=grid,
            in_specs=[
                pl.BlockSpec((TM, D), lambda i, j: (i, 0)),   # x tile
                pl.BlockSpec((D, TN), lambda i, j: (0, j)),   # centers tile
                pl.BlockSpec((1, TN), lambda i, j: (0, j)),   # ||c||^2 tile
            ],
            out_specs=pl.BlockSpec((TM, TN), lambda i, j: (i, j)),
        ),
        compiler_params=pltpu.CompilerParams(
            # No reduction axis: both grid axes are independent -> shard
            # across TensorCores (2x on v7x megacore).
            dimension_semantics=("parallel", "parallel"),
        ),
    )(x_p, c_p, centers_square)

    return centers, neg_dist_p[:B, :C]


def init_centers(key, feat_dim, n_classes):
    # Equivalent of nn.init.kaiming_normal_ on a (feat_dim, n_classes) tensor:
    # fan_in = n_classes, gain = sqrt(2) -> std = sqrt(2 / n_classes)
    std = jnp.sqrt(2.0 / n_classes)
    return std * jax.random.normal(key, (feat_dim, n_classes), dtype=jnp.float32)


def reference_forward(x, centers):
    fs = jnp.sum(x * x, axis=1, keepdims=True)
    cs = jnp.sum(centers * centers, axis=0, keepdims=True)
    fic = 2.0 * (x @ centers)
    return -(fs + cs - fic)


if __name__ == "__main__":
    key = jax.random.PRNGKey(0)
    k_x, k_c = jax.random.split(key)

    batch = 8
    feat_dim = 32
    n_classes = 16

    x = jax.random.normal(k_x, (batch, feat_dim), dtype=jnp.float32)
    centers = init_centers(k_c, feat_dim, n_classes)

    out_centers, neg_dist = dce_loss_forward(x, centers)
    jax.block_until_ready(neg_dist)

    ref = reference_forward(x, centers)
    assert neg_dist.shape == (batch, n_classes)
    assert jnp.allclose(neg_dist, ref, atol=1e-4, rtol=1e-4), "mismatch vs reference"
    assert out_centers.shape == (feat_dim, n_classes)

    # TODO(synk): for further gains, fuse the downstream softmax/cross-entropy
    # over -dist into this kernel to avoid the (B, C) HBM writeback entirely.

    print("KERNEL_OK")
</pallas_src>

<mosaic_0001>
module attributes {stable_mosaic.version = 11 : i64} {
  func.func @dce_loss_kernel(%arg0: i32, %arg1: i32, %arg2: memref<8x32xf32, #tpu.memory_space<vmem>>, %arg3: memref<32x128xf32, #tpu.memory_space<vmem>>, %arg4: memref<1x128xf32, #tpu.memory_space<vmem>>, %arg5: memref<8x128xf32, #tpu.memory_space<vmem>>) attributes {dimension_semantics = [#tpu.dimension_semantics<parallel>, #tpu.dimension_semantics<parallel>], iteration_bounds = array<i64: 1, 1>, scalar_prefetch = 0 : i64, scratch_operands = 0 : i64, tpu.core_type = #tpu.core_type<tc>, window_params = [{transform_indices = @transform_0, window_bounds = array<i64: 8, 32>}, {transform_indices = @transform_1, window_bounds = array<i64: 32, 128>}, {transform_indices = @transform_2, window_bounds = array<i64: 1, 128>}, {transform_indices = @transform_3, window_bounds = array<i64: 8, 128>}]} {
    %c0 = arith.constant 0 : index
    %c0_0 = arith.constant 0 : index
    %0 = vector.load %arg2[%c0, %c0_0] : memref<8x32xf32, #tpu.memory_space<vmem>>, vector<8x32xf32>
    %1 = arith.mulf %0, %0 : vector<8x32xf32>
    %cst = arith.constant dense<0.000000e+00> : vector<8xf32>
    %2 = vector.multi_reduction <add>, %1, %cst [1] : vector<8x32xf32> to vector<8xf32>
    %3 = vector.shape_cast %2 : vector<8xf32> to vector<8x1xf32>
    %c0_1 = arith.constant 0 : index
    %c0_2 = arith.constant 0 : index
    %4 = vector.load %arg3[%c0_1, %c0_2] : memref<32x128xf32, #tpu.memory_space<vmem>>, vector<32x128xf32>
    %cst_3 = arith.constant dense<0.000000e+00> : vector<8x128xf32>
    %5 = tpu.matmul %0, %4, %cst_3 {dimension_numbers = #tpu.dot_dimension_numbers<[1], [0], [0], [1], [0, 0, 1, 1], [], []>} : vector<8x32xf32>, vector<32x128xf32>, vector<8x128xf32> -> vector<8x128xf32>
    %cst_4 = arith.constant 2.000000e+00 : f32
    %6 = vector.broadcast %cst_4 : f32 to vector<8x128xf32>
    %7 = arith.mulf %6, %5 : vector<8x128xf32>
    %8 = vector.broadcast %3 : vector<8x1xf32> to vector<8x128xf32>
    %9 = arith.subf %7, %8 : vector<8x128xf32>
    %c0_5 = arith.constant 0 : index
    %c0_6 = arith.constant 0 : index
    %10 = vector.load %arg4[%c0_5, %c0_6] : memref<1x128xf32, #tpu.memory_space<vmem>>, vector<1x128xf32>
    %11 = vector.broadcast %10 : vector<1x128xf32> to vector<8x128xf32>
    %12 = arith.subf %9, %11 : vector<8x128xf32>
    %c0_7 = arith.constant 0 : index
    %c0_8 = arith.constant 0 : index
    %13 = vector.load %arg5[%c0_7, %c0_8] : memref<8x128xf32, #tpu.memory_space<vmem>>, vector<8x128xf32>
    tpu.vector_store %arg5[%c0_7, %c0_8], %12 {strides = array<i32>} : memref<8x128xf32, #tpu.memory_space<vmem>>, vector<8x128xf32>,
    return
  }
  func.func @transform_0(%arg0: i32, %arg1: i32) -> (i32, i32) {
    %c0_i32 = arith.constant 0 : i32
    %c0_i32_0 = arith.constant 0 : i32
    return %arg0, %c0_i32 : i32, i32
  }
  func.func @transform_1(%arg0: i32, %arg1: i32) -> (i32, i32) {
    %c0_i32 = arith.constant 0 : i32
    %c0_i32_0 = arith.constant 0 : i32
    return %c0_i32, %arg1 : i32, i32
  }
  func.func @transform_2(%arg0: i32, %arg1: i32) -> (i32, i32) {
    %c0_i32 = arith.constant 0 : i32
    %c0_i32_0 = arith.constant 0 : i32
    return %c0_i32, %arg1 : i32, i32
  }
  func.func @transform_3(%arg0: i32, %arg1: i32) -> (i32, i32) {
    %c0_i32 = arith.constant 0 : i32
    return %arg0, %arg1 : i32, i32
  }
}

</mosaic_0001>

<bundles_post_ra>
// kernel: tpu_custom_call.1
= control target key start
LH: loop header
LB: loop body
LE: loop exit
PB: predicated region body
PF: predicated region fallthrough
CT: control target
= control target key end

     0   :  { %8 = vsyncpa [#allocation3], 0  ;;  %s329_s0 = inlined_call_operand.hbm [shape: f32[8,32], index: 0, kind: input, shape index: {}]   ;;  %s330_s1 = inlined_call_operand.hbm [shape: f32[32,128], index: 1, kind: input, shape index: {}]   ;;  %s331_s2 = inlined_call_operand.vmem [shape: f32[1,128], index: 2, kind: input, shape index: {}]   ;;  %s332_s3 = inlined_call_operand.hbm [shape: f32[8,128], index: 3, kind: output, shape index: {}]  }
   0x1   :  { %9 = vsyncpa [#allocation6], 0 }
   0x2   :  { %10 = vsyncpa [#allocation4], 0  ;;  %s255_s12 = smov [#allocation2]   ;;  %s256_s14 = smov [#allocation5]  }
   0x3   :  { %s17_s13 = sshll.u32 %s255_s12, 4  ;;  %s26_s15 = sshll.u32 %s256_s14, 4  ;;  %s18_s13 = int_to_ptr.vmem [resolvable:$true] %s17_s13  ;;  %s283_s15 = int_to_ptr.vmem [resolvable:$true] %s26_s15 }
   0x4   :  { %s183_s18 = scalar_lea.hbm %s329_s0, 128 }
   0x5   :  { %p184_p0 = scmp.ne.s32.totalorder %s329_s0, %s183_s18  ;;  %p187_p1 = scmp.lt.u32.totalorder %s183_s18, %s329_s0 }
   0x7   :  { %p189_p2 = pnand %p187_p1, %p184_p0 }
   0x9   :  { %192 = shalt.err (!%p189_p2)
}
   0xa   :  { %s193_s23 = scalar_lea.vmem %s18_s13, 128  ;;  %p198_p4 = scmp.lt.s32.totalorder %s18_s13, %s18_s13 }
   0xb   :  { %p194_p3 = scmp.ne.s32.totalorder %s18_s13, %s193_s23  ;;  %p199_p5 = scmp.lt.s32.totalorder %s193_s23, %s193_s23 }
   0xd   :  { %p200_p6 = por %p199_p5, %p198_p4 }
   0xf   :  { %p201_p7 = pnand %p200_p6, %p194_p3 }
  0x11   :  { %204 = shalt.err (!%p201_p7)
}
  0x12   :  { %20 = dma.hbm_to_vmem [thread:$0]  %s329_s0, 128, %s18_s13, [#allocation3]  }
  0x13   :  { %s205_s28 = scalar_lea.hbm %s330_s1, 512 }
  0x14   :  { %p206_p8 = scmp.ne.s32.totalorder %s330_s1, %s205_s28  ;;  %p209_p9 = scmp.lt.u32.totalorder %s205_s28, %s330_s1 }
  0x16   :  { %p211_p10 = pnand %p209_p9, %p206_p8 }
  0x18   :  { %214 = shalt.err (!%p211_p10)
}
  0x19   :  { %s215_s6 = scalar_lea.vmem %s283_s15, 512  ;;  %p220_p12 = scmp.lt.s32.totalorder %s283_s15, %s283_s15 }
  0x1a   :  { %p216_p11 = scmp.ne.s32.totalorder %s283_s15, %s215_s6  ;;  %p221_p13 = scmp.lt.s32.totalorder %s215_s6, %s215_s6 }
  0x1c   :  { %p222_p0 = por %p221_p13, %p220_p12 }
  0x1e   :  { %p223_p1 = pnand %p222_p0, %p216_p11 }
  0x20   :  { %226 = shalt.err (!%p223_p1)
}
  0x21   :  { %s257_s0 = smov 128   ;;  %s258_s7 = smov 8  }
  0x22   :  { %32 = dma.hbm_to_vmem [thread:$0]  %s330_s1, 512, %s283_s15, [#allocation6], %s257_s0, %s257_s0, %s258_s7  }
  0x23   :  { %249 = dma.done.wait [#allocation3], 128  }
  0x24   :  { %250 = vsyncadd [#allocation3], 4294967168 }
  0x25   :  { %251 = dma.done.wait [#allocation6], 512  }
  0x26   :  { %252 = vsyncadd [#allocation6], 4294966784  ;;  %v259_v0 = vmov 0.0|0.0   ;;  %vm260_vm0 = vmmov 0   ;;  %v261_v1 = vmov 0.0   ;;  %v47_v2 = vld [vmem:[#allocation5] sm:$0xff] }
  0x27   :  { %169 = vmatprep.subr.bf16.mxu0 %v259_v0  ;;  %166 = vmatprep.mubr.msk.f32.mxu0 %vm260_vm0, %v261_v1  ;;  %v48_v3 = vld [vmem:[#allocation5 + $0x8] sm:$0xff]  ;;  %v49_v4 = vld [vmem:[#allocation5 + $0x10] sm:$0xff]  ;;  %v50_v6 = vld [vmem:[#allocation5 + $0x18] sm:$0xff]  ;;  %vm43_vm1 = vcmask 261120   ;;  %s262_s11 = smov [#allocation7]  }
  0x28   :  { %v170_v5 = vpack.c.bf16 %v48_v3, %v47_v2  ;;  %v41_v7 = vld [vmem:[#allocation2] sm:$0xff]  ;;  %v173_v9 = vpack.c.bf16 %v50_v6, %v49_v4  ;;  %s141_s12 = sshll.u32 %s262_s11, 4  ;;  %s142_s12 = int_to_ptr.vmem [resolvable:$true] %s141_s12 }
  0x29   :  { %v42_v8 = vmul.f32 %v41_v7, %v41_v7  ;;  %v152_v15 = vld [vmem:[%s331_s2] ss:$0 sm:$0xff]  ;;  %s227_s13 = scalar_lea.vmem %s142_s12, 128  ;;  %p232_p3 = scmp.lt.s32.totalorder %s142_s12, %s142_s12 }
  0x2a   :  { %171 = vmatpush3.bf16.msra.mxu0 %v170_v5  ;;  %p228_p2 = scmp.ne.s32.totalorder %s142_s12, %s227_s13  ;;  %p233_p4 = scmp.lt.s32.totalorder %s227_s13, %s227_s13 }
  0x2b   :  { %172 = vmatprep.subr.bf16.mxu0 %v259_v0  ;;  %v44_v10 = vsel %vm43_vm1, %v42_v8, 0.0 }
  0x2c   :  { %45 = vadd.xlane.f32.xlu0 %v44_v10  ;;  %p234_p5 = por %p233_p4, %p232_p3 }
  0x2e   :  { %174 = vmatpush3.bf16.msra.mxu0 %v173_v9  ;;  %p235_p6 = pnand %p234_p5, %p228_p2 }
  0x31   :  { %167 = vmatmul.mubr.msk.f32.vlgmr.msra.gmra.mrb[0].mxu0 %vm43_vm1, %v41_v7 }
  0xb9   :  { %v46_v12 = vpop.xlane.xlu0 %45 }
 0x104   :  { %v120_v11 = vpop.f32.mrb[0].mxu0 }
 0x105   :  { %v124_v13 = vmul.f32 2.0, %v120_v11  ;;  %v168_v14 = vpop.f32.mrb[1].mxu0 }
 0x107   :  { %v125_v16 = vsub.f32 %v124_v13, %v46_v12 }
 0x109   :  { %v133_v17 = vsub.f32 %v125_v16, %v152_v15 }
 0x10b   :  { %134 = vst [vmem:[#allocation7] sm:$0xff] %v133_v17 }
 0x10c   :  { %238 = shalt.err (!%p235_p6)
}
 0x10d   :  { %s239_s16 = scalar_lea.hbm %s332_s3, 128 }
 0x10e   :  { %p240_p7 = scmp.ne.s32.totalorder %s332_s3, %s239_s16  ;;  %p243_p8 = scmp.lt.u32.totalorder %s239_s16, %s332_s3 }
 0x110   :  { %p245_p9 = pnand %p243_p8, %p240_p7 }
 0x112   :  { %248 = shalt.err (!%p245_p9)
}
 0x113   :  { %144 = dma.vmem_to_hbm [thread:$0]  %s142_s12, 128, %s332_s3, [#allocation4]  }
 0x114   :  { %253 = dma.done.wait [#allocation4], 128  }
 0x115   :  { %254 = vsyncadd [#allocation4], 4294967168 }
 0x116   :  { %148 = vsyncpa [#allocation3], 1 }
 0x117   :  { %149 = vsyncpa [#allocation6], 1 }
 0x118   :  { %150 = vsyncpa [#allocation4], 1 }

</bundles_post_ra>
